<compile_context>
chip_gen: v7x
topology: tpu7x:2x2x1
jax: 0.10.0
libtpu: 0.0.40
codegen_flags: <defaults>
</compile_context>

<pallas_src>
import functools

import jax
import jax.numpy as jnp
from jax import lax
from jax.experimental import pallas as pl
from jax.experimental.pallas import tpu as pltpu
import numpy as np


def _group_weights_row(ps, ng, *, shot_nums, k_patch, n_patch):
    """Per-group softmax(w_ps)/softmax(w_ng) on lane-dense [1,B] vectors."""
    f32 = jnp.float32
    e, temp = 1e-5, 0.5
    B = ps.shape[1]
    G = len(shot_nums)

    # static group-id vector (groups are contiguous index ranges)
    col_i = lax.broadcasted_iota(jnp.int32, (1, B), 1)
    gid = jnp.zeros((1, B), jnp.int32)
    off = 0
    for s in shot_nums[:-1]:
        off += s * k_patch
        gid = gid + (col_i >= off).astype(jnp.int32)

    # per-element scale constants: 1 / (group_denominator * temp)
    scale_ps = jnp.zeros_like(ps)
    scale_ng = jnp.zeros_like(ng)
    for g, s in enumerate(shot_nums):
        in_g = gid == g
        scale_ps = jnp.where(in_g, f32(1.0 / ((k_patch * s - k_patch + e) * temp)), scale_ps)
        scale_ng = jnp.where(in_g, f32(1.0 / ((n_patch - k_patch * s + e) * temp)), scale_ng)

    gmask_b = lax.broadcasted_iota(jnp.int32, (G, B), 0) == gid   # [G,B] bool one-hot
    gmask_f = gmask_b.astype(f32)                                 # single cast, reused

    def seg_softmax(v):                                           # v: [1,B]
        vm = jnp.where(gmask_b, v, f32(-1e30))                    # [G,B]
        gmax = jnp.max(vm, axis=1, keepdims=True)                 # [G,1] per-group max
        vmax = jnp.sum(gmask_f * gmax, axis=0, keepdims=True)     # [1,B] per-element group max
        ex = jnp.exp(v - vmax)                                    # [1,B]
        gsum = jnp.sum(gmask_f * ex, axis=1, keepdims=True)       # [G,1] per-group sum
        vsum = jnp.sum(gmask_f * gsum, axis=0, keepdims=True)     # [1,B] per-element group sum
        return ex / vsum                                          # exact divide (tiny vector)

    w_ps = seg_softmax(ps * scale_ps)
    w_ng = seg_softmax(ng * scale_ng)
    return w_ps / w_ng                                            # exact divide (tiny vector)


def _cora_kernel(feat_ref, qemb_ref, lrow_ref, loss_ref, wct_ref,
                 *, shot_nums, k_patch, temperature, base_temperature):
    f32 = jnp.float32
    B = feat_ref.shape[0]
    n_patch = sum(shot_nums) * k_patch
    n_support = sum(shot_nums)
    inv_temp = f32(1.0 / temperature)
    loss_scale = f32(-(temperature / base_temperature))

    # --------------------------- masks from iota -----------------------------
    row_ii = lax.broadcasted_iota(jnp.int32, (B, B), 0)
    col_ii = lax.broadcasted_iota(jnp.int32, (B, B), 1)
    diag = row_ii == col_ii

    # patch ids via threshold accumulation (avoids integer division lowering)
    r_i = lax.broadcasted_iota(jnp.int32, (B, 1), 0)
    c_i = lax.broadcasted_iota(jnp.int32, (1, B), 1)
    pid_row = jnp.zeros((B, 1), jnp.int32)
    pid_col = jnp.zeros((1, B), jnp.int32)
    for p in range(1, n_support):
        thr = p * k_patch
        pid_row = pid_row + (r_i >= thr).astype(jnp.int32)
        pid_col = pid_col + (c_i >= thr).astype(jnp.int32)
    same_patch = pid_row == pid_col                               # K_patch x K_patch block-diag

    # labels arrive in row layout only; derive the column copy in-kernel
    lab_row = lrow_ref[...].astype(f32)                           # [1,B]
    lab_col = jnp.sum(jnp.where(diag, jnp.broadcast_to(lab_row, (B, B)), f32(0.0)),
                      axis=1, keepdims=True)                      # [B,1]
    same_cls = lab_col == lab_row                                 # [B,B] bool

    # ------------------ weight-patch branch (is_weight_patch=True) -----------
    qemb = qemb_ref[...]
    sq = jnp.sum(qemb * qemb, axis=1, keepdims=True)
    qn = qemb * lax.rsqrt(jnp.maximum(sq, f32(1e-24)))            # F.normalize(q_emb, dim=1)
    # TODO(synk): use bf16 MXU Grams for production-size D/B; f32 at this tiny shape.
    simscore = lax.dot_general(qn, qn, (((1,), (1,)), ((), ())),
                               preferred_element_type=f32)        # [B,B]

    # masks folded directly into the reductions (no persistent sim_ps/sim_ng);
    # simscore and the masks are symmetric, so the axis-0 sum equals the
    # reference's per-row sum and lands directly in lane-dense [1,B] layout.
    ps_row = jnp.sum(jnp.where(same_cls & jnp.logical_not(same_patch), simscore, f32(0.0)),
                     axis=0, keepdims=True)                       # [1,B]
    ng_row = jnp.sum(jnp.where(same_cls, f32(0.0), simscore),
                     axis=0, keepdims=True)                       # [1,B]

    w_c_row = _group_weights_row(ps_row, ng_row, shot_nums=shot_nums,
                                 k_patch=k_patch, n_patch=n_patch)  # [1,B]
    # column copy of w_c via diag-masked reduce (replaces the 2nd group softmax)
    w_c_col = jnp.sum(jnp.where(diag, jnp.broadcast_to(w_c_row, (B, B)), f32(0.0)),
                      axis=1, keepdims=True)                      # [B,1]

    # -------------------- SupCon loss with patch re-weighting ----------------
    feats = feat_ref[...]
    adc = lax.dot_general(feats, feats, (((1,), (1,)), ((), ())),
                          preferred_element_type=f32) * inv_temp  # [B,B]
    logits_max = jnp.max(adc, axis=1, keepdims=True)
    # weight_pair = w_c.T @ w_c fused as two broadcast multiplies (no K=1 matmul)
    logits = (adc - logits_max) * w_c_col * w_c_row

    exp_logits = jnp.where(diag, f32(0.0), jnp.exp(logits))       # exp(logits) * logits_mask
    denom = jnp.sum(exp_logits, axis=1, keepdims=True)            # [B,1]
    log_prob = logits - jnp.log(denom)

    mask_f = (same_cls & jnp.logical_not(diag)).astype(f32)
    pos_cnt = jnp.sum(mask_f, axis=1, keepdims=True)              # [B,1]; 0 -> NaN like the reference
    mlpp = jnp.sum(mask_f * log_prob, axis=1, keepdims=True) / pos_cnt
    loss_rows = loss_scale * mlpp                                  # [B,1]

    loss_ref[...] = jnp.sum(loss_rows, axis=0, keepdims=True) * f32(1.0 / B)  # [1,1]
    wct_ref[...] = w_c_row                                                     # [1,B] lane-dense


def cora_forward(features, q_emb, labels, shot_nums, k_patch,
                 temperature=0.3, base_temperature=0.07):
    """Pallas implementation of CoRA.forward(features, labels, shot_nums,
    is_weight_patch=True, q_emb=q_emb, K_patch=k_patch). Returns (loss, w_c.T)."""
    B, D = features.shape
    Dq = q_emb.shape[1]
    shot_nums = tuple(int(s) for s in shot_nums)
    k_patch = int(k_patch)
    # Structural assumptions baked into the iota-built masks (same as the
    # reference's slicing): contiguous groups / patches, B == sum(shots)*K.
    assert B == sum(shot_nums) * k_patch, "B must equal sum(shot_nums) * K_patch"

    labels_row = labels.astype(jnp.int32).reshape(1, B)

    kernel = functools.partial(
        _cora_kernel,
        shot_nums=shot_nums,
        k_patch=k_patch,
        temperature=float(temperature),
        base_temperature=float(base_temperature),
    )

    loss2d, wct_row = pl.pallas_call(
        kernel,
        out_shape=(jax.ShapeDtypeStruct((1, 1), jnp.float32),
                   jax.ShapeDtypeStruct((1, B), jnp.float32)),
        grid_spec=pl.GridSpec(
            grid=(1,),
            in_specs=[pl.BlockSpec((B, D), lambda i: (0, 0)),
                      pl.BlockSpec((B, Dq), lambda i: (0, 0)),
                      pl.BlockSpec((1, B), lambda i: (0, 0))],
            out_specs=(pl.BlockSpec((1, 1), lambda i: (0, 0)),
                       pl.BlockSpec((1, B), lambda i: (0, 0))),
        ),
        compiler_params=pltpu.CompilerParams(
            dimension_semantics=("arbitrary",),
            vmem_limit_bytes=32 * 1024 * 1024),
    )(features, q_emb, labels_row)
    # w_c output is lane-dense [1,B] in-kernel; present it as [B,1] (== torch w_c.T)
    return loss2d[0, 0], wct_row.reshape(B, 1)


def cora_ref(features, q_emb, labels, shot_nums, k_patch,
             temperature=0.3, base_temperature=0.07):
    """Plain-JAX (float32) mirror of the PyTorch forward, for verification."""
    B = features.shape[0]
    labels = labels.reshape(-1, 1)
    mask = (labels == labels.T).astype(jnp.float32)
    adc = features @ features.T

    qn = q_emb / jnp.maximum(jnp.linalg.norm(q_emb, axis=1, keepdims=True), 1e-12)
    sim = qn @ qn.T
    ids = jnp.arange(B)
    bd = ((ids[:, None] // k_patch) == (ids[None, :] // k_patch)).astype(jnp.float32)
    sim_ps = sim * mask * (1.0 - bd)
    sim_ng = sim * (1.0 - mask)
    e, temp = 1e-5, 0.5
    n_patch = sum(shot_nums) * k_patch
    wcs, point = [], 0
    for s in shot_nums:
        g = s * k_patch
        w_ps = sim_ps[point:point + g].sum(-1) / (k_patch * s - k_patch + e)
        w_ng = sim_ng[point:point + g].sum(-1) / (n_patch - k_patch * s + e)
        w_ps = jax.nn.softmax(w_ps / temp)
        w_ng = jax.nn.softmax(w_ng / temp)
        wcs.append(w_ps / w_ng)
        point += g
    w_c = jnp.concatenate(wcs)[None, :]
    weight_pair = w_c.T @ w_c

    adc = adc / temperature
    logits = (adc - adc.max(axis=1, keepdims=True)) * weight_pair
    logits_mask = 1.0 - jnp.eye(B)
    mask_f = mask * logits_mask
    exp_logits = jnp.exp(logits) * logits_mask
    log_prob = logits - jnp.log(exp_logits.sum(1, keepdims=True))
    mlpp = (mask_f * log_prob).sum(1) / mask_f.sum(1)
    loss = jnp.mean(-(temperature / base_temperature) * mlpp)
    return loss, w_c.T


if __name__ == "__main__":
    key = jax.random.PRNGKey(0)
    shot_nums = (2, 2)       # 2-way, 2-shot
    K_patch = 4
    B = sum(shot_nums) * K_patch     # 16 patch embeddings
    D, Dq = 32, 32

    k1, k2 = jax.random.split(key)
    features = jax.random.normal(k1, (B, D), jnp.float32)
    features = features / jnp.linalg.norm(features, axis=1, keepdims=True)
    q_emb = jax.random.normal(k2, (B, Dq), jnp.float32)
    labels = jnp.concatenate(
        [jnp.full((s * K_patch,), w, jnp.int32) for w, s in enumerate(shot_nums)])

    loss, wct = cora_forward(features, q_emb, labels, shot_nums, K_patch)
    jax.block_until_ready((loss, wct))

    loss_r, wct_r = cora_ref(features, q_emb, labels, shot_nums, K_patch)
    np.testing.assert_allclose(np.asarray(loss), np.asarray(loss_r),
                               rtol=1e-2, atol=1e-2)
    np.testing.assert_allclose(np.asarray(wct), np.asarray(wct_r),
                               rtol=1e-2, atol=1e-2)

    print("KERNEL_OK")
</pallas_src>

<mosaic_0001>
module attributes {stable_mosaic.version = 11 : i64} {
  func.func @_cora_kernel(%arg0: i32, %arg1: memref<16x32xf32, #tpu.memory_space<vmem>>, %arg2: memref<16x32xf32, #tpu.memory_space<vmem>>, %arg3: memref<1x16xi32, #tpu.memory_space<vmem>>, %arg4: memref<1x1xf32, #tpu.memory_space<vmem>>, %arg5: memref<1x16xf32, #tpu.memory_space<vmem>>) attributes {dimension_semantics = [#tpu.dimension_semantics<arbitrary>], iteration_bounds = array<i64: 1>, scalar_prefetch = 0 : i64, scratch_operands = 0 : i64, tpu.core_type = #tpu.core_type<tc>, window_params = [{pipeline_mode = #tpu.pipeline_mode<synchronous>, transform_indices = @transform_0, window_bounds = array<i64: 16, 32>}, {pipeline_mode = #tpu.pipeline_mode<synchronous>, transform_indices = @transform_1, window_bounds = array<i64: 16, 32>}, {pipeline_mode = #tpu.pipeline_mode<synchronous>, transform_indices = @transform_2, window_bounds = array<i64: 1, 16>}, {pipeline_mode = #tpu.pipeline_mode<synchronous>, transform_indices = @transform_3, window_bounds = array<i64: 1, 1>}, {pipeline_mode = #tpu.pipeline_mode<synchronous>, transform_indices = @transform_4, window_bounds = array<i64: 1, 16>}]} {
    %0 = tpu.iota {dimensions = array<i32: 0>} : vector<16x16xi32>
    %1 = tpu.iota {dimensions = array<i32: 1>} : vector<16x16xi32>
    %2 = arith.cmpi eq, %0, %1 : vector<16x16xi32>
    %3 = tpu.iota {dimensions = array<i32: 0>} : vector<16x1xi32>
    %4 = tpu.iota {dimensions = array<i32: 1>} : vector<1x16xi32>
    %c0_i32 = arith.constant 0 : i32
    %5 = vector.broadcast %c0_i32 : i32 to vector<16x1xi32>
    %c0_i32_0 = arith.constant 0 : i32
    %6 = vector.broadcast %c0_i32_0 : i32 to vector<1x16xi32>
    %c4_i32 = arith.constant 4 : i32
    %7 = vector.broadcast %c4_i32 : i32 to vector<16x1xi32>
    %8 = arith.cmpi sge, %3, %7 : vector<16x1xi32>
    %9 = arith.extui %8 : vector<16x1xi1> to vector<16x1xi32>
    %10 = arith.addi %5, %9 : vector<16x1xi32>
    %c4_i32_1 = arith.constant 4 : i32
    %11 = vector.broadcast %c4_i32_1 : i32 to vector<1x16xi32>
    %12 = arith.cmpi sge, %4, %11 : vector<1x16xi32>
    %13 = arith.extui %12 : vector<1x16xi1> to vector<1x16xi32>
    %14 = arith.addi %6, %13 : vector<1x16xi32>
    %c8_i32 = arith.constant 8 : i32
    %15 = vector.broadcast %c8_i32 : i32 to vector<16x1xi32>
    %16 = arith.cmpi sge, %3, %15 : vector<16x1xi32>
    %17 = arith.extui %16 : vector<16x1xi1> to vector<16x1xi32>
    %18 = arith.addi %10, %17 : vector<16x1xi32>
    %c8_i32_2 = arith.constant 8 : i32
    %19 = vector.broadcast %c8_i32_2 : i32 to vector<1x16xi32>
    %20 = arith.cmpi sge, %4, %19 : vector<1x16xi32>
    %21 = arith.extui %20 : vector<1x16xi1> to vector<1x16xi32>
    %22 = arith.addi %14, %21 : vector<1x16xi32>
    %c12_i32 = arith.constant 12 : i32
    %23 = vector.broadcast %c12_i32 : i32 to vector<16x1xi32>
    %24 = arith.cmpi sge, %3, %23 : vector<16x1xi32>
    %25 = arith.extui %24 : vector<16x1xi1> to vector<16x1xi32>
    %26 = arith.addi %18, %25 : vector<16x1xi32>
    %c12_i32_3 = arith.constant 12 : i32
    %27 = vector.broadcast %c12_i32_3 : i32 to vector<1x16xi32>
    %28 = arith.cmpi sge, %4, %27 : vector<1x16xi32>
    %29 = arith.extui %28 : vector<1x16xi1> to vector<1x16xi32>
    %30 = arith.addi %22, %29 : vector<1x16xi32>
    %31 = vector.broadcast %26 : vector<16x1xi32> to vector<16x16xi32>
    %32 = vector.broadcast %30 : vector<1x16xi32> to vector<16x16xi32>
    %33 = arith.cmpi eq, %31, %32 : vector<16x16xi32>
    %c0 = arith.constant 0 : index
    %c0_4 = arith.constant 0 : index
    %34 = vector.load %arg3[%c0, %c0_4] : memref<1x16xi32, #tpu.memory_space<vmem>>, vector<1x16xi32>
    %35 = arith.sitofp %34 : vector<1x16xi32> to vector<1x16xf32>
    %36 = vector.shape_cast %35 : vector<1x16xf32> to vector<1x16xf32>
    %37 = vector.broadcast %36 : vector<1x16xf32> to vector<16x16xf32>
    %cst = arith.constant 0.000000e+00 : f32
    %38 = vector.broadcast %cst : f32 to vector<16x16xf32>
    %39 = arith.select %2, %37, %38 : vector<16x16xi1>, vector<16x16xf32>
    %cst_5 = arith.constant dense<0.000000e+00> : vector<16xf32>
    %40 = vector.multi_reduction <add>, %39, %cst_5 [1] : vector<16x16xf32> to vector<16xf32>
    %41 = vector.shape_cast %40 : vector<16xf32> to vector<16x1xf32>
    %42 = vector.broadcast %41 : vector<16x1xf32> to vector<16x16xf32>
    %43 = vector.broadcast %35 : vector<1x16xf32> to vector<16x16xf32>
    %44 = arith.cmpf oeq, %42, %43 : vector<16x16xf32>
    %c0_6 = arith.constant 0 : index
    %c0_7 = arith.constant 0 : index
    %45 = vector.load %arg2[%c0_6, %c0_7] : memref<16x32xf32, #tpu.memory_space<vmem>>, vector<16x32xf32>
    %46 = arith.mulf %45, %45 : vector<16x32xf32>
    %cst_8 = arith.constant dense<0.000000e+00> : vector<16xf32>
    %47 = vector.multi_reduction <add>, %46, %cst_8 [1] : vector<16x32xf32> to vector<16xf32>
    %48 = vector.shape_cast %47 : vector<16xf32> to vector<16x1xf32>
    %cst_9 = arith.constant 1.000000e-24 : f32
    %49 = vector.broadcast %cst_9 : f32 to vector<16x1xf32>
    %50 = arith.maximumf %48, %49 : vector<16x1xf32>
    %51 = math.rsqrt %50 : vector<16x1xf32>
    %52 = vector.broadcast %51 : vector<16x1xf32> to vector<16x32xf32>
    %53 = arith.mulf %45, %52 : vector<16x32xf32>
    %cst_10 = arith.constant dense<0.000000e+00> : vector<16x16xf32>
    %54 = tpu.matmul %53, %53, %cst_10 {dimension_numbers = #tpu.dot_dimension_numbers<[1], [1], [0], [0], [0, 0, 1, 0], [], []>} : vector<16x32xf32>, vector<16x32xf32>, vector<16x16xf32> -> vector<16x16xf32>
    %cst_11 = arith.constant dense<true> : vector<16x16xi1>
    %55 = arith.xori %33, %cst_11 : vector<16x16xi1>
    %56 = arith.andi %44, %55 : vector<16x16xi1>
    %cst_12 = arith.constant 0.000000e+00 : f32
    %57 = vector.broadcast %cst_12 : f32 to vector<16x16xf32>
    %58 = arith.select %56, %54, %57 : vector<16x16xi1>, vector<16x16xf32>
    %cst_13 = arith.constant dense<0.000000e+00> : vector<16xf32>
    %59 = vector.multi_reduction <add>, %58, %cst_13 [0] : vector<16x16xf32> to vector<16xf32>
    %60 = vector.shape_cast %59 : vector<16xf32> to vector<1x16xf32>
    %cst_14 = arith.constant 0.000000e+00 : f32
    %61 = vector.broadcast %cst_14 : f32 to vector<16x16xf32>
    %62 = arith.select %44, %61, %54 : vector<16x16xi1>, vector<16x16xf32>
    %cst_15 = arith.constant dense<0.000000e+00> : vector<16xf32>
    %63 = vector.multi_reduction <add>, %62, %cst_15 [0] : vector<16x16xf32> to vector<16xf32>
    %64 = vector.shape_cast %63 : vector<16xf32> to vector<1x16xf32>
    %65 = tpu.iota {dimensions = array<i32: 1>} : vector<1x16xi32>
    %c0_i32_16 = arith.constant 0 : i32
    %66 = vector.broadcast %c0_i32_16 : i32 to vector<1x16xi32>
    %c8_i32_17 = arith.constant 8 : i32
    %67 = vector.broadcast %c8_i32_17 : i32 to vector<1x16xi32>
    %68 = arith.cmpi sge, %65, %67 : vector<1x16xi32>
    %69 = arith.extui %68 : vector<1x16xi1> to vector<1x16xi32>
    %70 = arith.addi %66, %69 : vector<1x16xi32>
    %cst_18 = arith.constant 0.000000e+00 : f32
    %71 = vector.broadcast %cst_18 : f32 to vector<1x16xf32>
    %cst_19 = arith.constant 0.000000e+00 : f32
    %72 = vector.broadcast %cst_19 : f32 to vector<1x16xf32>
    %c0_i32_20 = arith.constant 0 : i32
    %73 = vector.broadcast %c0_i32_20 : i32 to vector<1x16xi32>
    %74 = arith.cmpi eq, %70, %73 : vector<1x16xi32>
    %cst_21 = arith.constant 0.499998748 : f32
    %75 = vector.broadcast %cst_21 : f32 to vector<1x16xf32>
    %76 = arith.select %74, %75, %71 : vector<1x16xi1>, vector<1x16xf32>
    %cst_22 = arith.constant 0.249999687 : f32
    %77 = vector.broadcast %cst_22 : f32 to vector<1x16xf32>
    %78 = arith.select %74, %77, %72 : vector<1x16xi1>, vector<1x16xf32>
    %c1_i32 = arith.constant 1 : i32
    %79 = vector.broadcast %c1_i32 : i32 to vector<1x16xi32>
    %80 = arith.cmpi eq, %70, %79 : vector<1x16xi32>
    %cst_23 = arith.constant 0.499998748 : f32
    %81 = vector.broadcast %cst_23 : f32 to vector<1x16xf32>
    %82 = arith.select %80, %81, %76 : vector<1x16xi1>, vector<1x16xf32>
    %cst_24 = arith.constant 0.249999687 : f32
    %83 = vector.broadcast %cst_24 : f32 to vector<1x16xf32>
    %84 = arith.select %80, %83, %78 : vector<1x16xi1>, vector<1x16xf32>
    %85 = tpu.iota {dimensions = array<i32: 0>} : vector<2x16xi32>
    %86 = vector.broadcast %70 : vector<1x16xi32> to vector<2x16xi32>
    %87 = arith.cmpi eq, %85, %86 : vector<2x16xi32>
    %88 = arith.extui %87 : vector<2x16xi1> to vector<2x16xi32>
    %89 = arith.sitofp %88 : vector<2x16xi32> to vector<2x16xf32>
    %90 = arith.mulf %60, %82 : vector<1x16xf32>
    %cst_25 = arith.constant -1.000000e+30 : f32
    %91 = vector.shape_cast %90 : vector<1x16xf32> to vector<1x16xf32>
    %92 = vector.broadcast %91 : vector<1x16xf32> to vector<2x16xf32>
    %93 = vector.broadcast %cst_25 : f32 to vector<2x16xf32>
    %94 = arith.select %87, %92, %93 : vector<2x16xi1>, vector<2x16xf32>
    %cst_26 = arith.constant dense<0xFF800000> : vector<2xf32>
    %95 = vector.multi_reduction <maximumf>, %94, %cst_26 [1] : vector<2x16xf32> to vector<2xf32>
    %96 = vector.shape_cast %95 : vector<2xf32> to vector<2x1xf32>
    %97 = vector.broadcast %96 : vector<2x1xf32> to vector<2x16xf32>
    %98 = arith.mulf %89, %97 : vector<2x16xf32>
    %cst_27 = arith.constant dense<0.000000e+00> : vector<16xf32>
    %99 = vector.multi_reduction <add>, %98, %cst_27 [0] : vector<2x16xf32> to vector<16xf32>
    %100 = vector.shape_cast %99 : vector<16xf32> to vector<1x16xf32>
    %101 = arith.subf %90, %100 : vector<1x16xf32>
    %102 = math.exp %101 : vector<1x16xf32>
    %103 = vector.broadcast %102 : vector<1x16xf32> to vector<2x16xf32>
    %104 = arith.mulf %89, %103 : vector<2x16xf32>
    %cst_28 = arith.constant dense<0.000000e+00> : vector<2xf32>
    %105 = vector.multi_reduction <add>, %104, %cst_28 [1] : vector<2x16xf32> to vector<2xf32>
    %106 = vector.shape_cast %105 : vector<2xf32> to vector<2x1xf32>
    %107 = vector.broadcast %106 : vector<2x1xf32> to vector<2x16xf32>
    %108 = arith.mulf %89, %107 : vector<2x16xf32>
    %cst_29 = arith.constant dense<0.000000e+00> : vector<16xf32>
    %109 = vector.multi_reduction <add>, %108, %cst_29 [0] : vector<2x16xf32> to vector<16xf32>
    %110 = vector.shape_cast %109 : vector<16xf32> to vector<1x16xf32>
    %111 = arith.divf %102, %110 : vector<1x16xf32>
    %112 = arith.mulf %64, %84 : vector<1x16xf32>
    %cst_30 = arith.constant -1.000000e+30 : f32
    %113 = vector.shape_cast %112 : vector<1x16xf32> to vector<1x16xf32>
    %114 = vector.broadcast %113 : vector<1x16xf32> to vector<2x16xf32>
    %115 = vector.broadcast %cst_30 : f32 to vector<2x16xf32>
    %116 = arith.select %87, %114, %115 : vector<2x16xi1>, vector<2x16xf32>
    %cst_31 = arith.constant dense<0xFF800000> : vector<2xf32>
    %117 = vector.multi_reduction <maximumf>, %116, %cst_31 [1] : vector<2x16xf32> to vector<2xf32>
    %118 = vector.shape_cast %117 : vector<2xf32> to vector<2x1xf32>
    %119 = vector.broadcast %118 : vector<2x1xf32> to vector<2x16xf32>
    %120 = arith.mulf %89, %119 : vector<2x16xf32>
    %cst_32 = arith.constant dense<0.000000e+00> : vector<16xf32>
    %121 = vector.multi_reduction <add>, %120, %cst_32 [0] : vector<2x16xf32> to vector<16xf32>
    %122 = vector.shape_cast %121 : vector<16xf32> to vector<1x16xf32>
    %123 = arith.subf %112, %122 : vector<1x16xf32>
    %124 = math.exp %123 : vector<1x16xf32>
    %125 = vector.broadcast %124 : vector<1x16xf32> to vector<2x16xf32>
    %126 = arith.mulf %89, %125 : vector<2x16xf32>
    %cst_33 = arith.constant dense<0.000000e+00> : vector<2xf32>
    %127 = vector.multi_reduction <add>, %126, %cst_33 [1] : vector<2x16xf32> to vector<2xf32>
    %128 = vector.shape_cast %127 : vector<2xf32> to vector<2x1xf32>
    %129 = vector.broadcast %128 : vector<2x1xf32> to vector<2x16xf32>
    %130 = arith.mulf %89, %129 : vector<2x16xf32>
    %cst_34 = arith.constant dense<0.000000e+00> : vector<16xf32>
    %131 = vector.multi_reduction <add>, %130, %cst_34 [0] : vector<2x16xf32> to vector<16xf32>
    %132 = vector.shape_cast %131 : vector<16xf32> to vector<1x16xf32>
    %133 = arith.divf %124, %132 : vector<1x16xf32>
    %134 = arith.divf %111, %133 : vector<1x16xf32>
    %135 = vector.shape_cast %134 : vector<1x16xf32> to vector<1x16xf32>
    %136 = vector.broadcast %135 : vector<1x16xf32> to vector<16x16xf32>
    %cst_35 = arith.constant 0.000000e+00 : f32
    %137 = vector.broadcast %cst_35 : f32 to vector<16x16xf32>
    %138 = arith.select %2, %136, %137 : vector<16x16xi1>, vector<16x16xf32>
    %cst_36 = arith.constant dense<0.000000e+00> : vector<16xf32>
    %139 = vector.multi_reduction <add>, %138, %cst_36 [1] : vector<16x16xf32> to vector<16xf32>
    %140 = vector.shape_cast %139 : vector<16xf32> to vector<16x1xf32>
    %c0_37 = arith.constant 0 : index
    %c0_38 = arith.constant 0 : index
    %141 = vector.load %arg1[%c0_37, %c0_38] : memref<16x32xf32, #tpu.memory_space<vmem>>, vector<16x32xf32>
    %cst_39 = arith.constant dense<0.000000e+00> : vector<16x16xf32>
    %142 = tpu.matmul %141, %141, %cst_39 {dimension_numbers = #tpu.dot_dimension_numbers<[1], [1], [0], [0], [0, 0, 1, 0], [], []>} : vector<16x32xf32>, vector<16x32xf32>, vector<16x16xf32> -> vector<16x16xf32>
    %cst_40 = arith.constant 3.33333325 : f32
    %143 = vector.broadcast %cst_40 : f32 to vector<16x16xf32>
    %144 = arith.mulf %142, %143 : vector<16x16xf32>
    %cst_41 = arith.constant dense<0xFF800000> : vector<16xf32>
    %145 = vector.multi_reduction <maximumf>, %144, %cst_41 [1] : vector<16x16xf32> to vector<16xf32>
    %146 = vector.shape_cast %145 : vector<16xf32> to vector<16x1xf32>
    %147 = vector.broadcast %146 : vector<16x1xf32> to vector<16x16xf32>
    %148 = arith.subf %144, %147 : vector<16x16xf32>
    %149 = vector.broadcast %140 : vector<16x1xf32> to vector<16x16xf32>
    %150 = arith.mulf %148, %149 : vector<16x16xf32>
    %151 = vector.broadcast %134 : vector<1x16xf32> to vector<16x16xf32>
    %152 = arith.mulf %150, %151 : vector<16x16xf32>
    %153 = math.exp %152 : vector<16x16xf32>
    %cst_42 = arith.constant 0.000000e+00 : f32
    %154 = vector.broadcast %cst_42 : f32 to vector<16x16xf32>
    %155 = arith.select %2, %154, %153 : vector<16x16xi1>, vector<16x16xf32>
    %cst_43 = arith.constant dense<0.000000e+00> : vector<16xf32>
    %156 = vector.multi_reduction <add>, %155, %cst_43 [1] : vector<16x16xf32> to vector<16xf32>
    %157 = vector.shape_cast %156 : vector<16xf32> to vector<16x1xf32>
    %158 = math.log %157 : vector<16x1xf32>
    %159 = vector.broadcast %158 : vector<16x1xf32> to vector<16x16xf32>
    %160 = arith.subf %152, %159 : vector<16x16xf32>
    %cst_44 = arith.constant dense<true> : vector<16x16xi1>
    %161 = arith.xori %2, %cst_44 : vector<16x16xi1>
    %162 = arith.andi %44, %161 : vector<16x16xi1>
    %163 = arith.extui %162 : vector<16x16xi1> to vector<16x16xi32>
    %164 = arith.sitofp %163 : vector<16x16xi32> to vector<16x16xf32>
    %cst_45 = arith.constant dense<0.000000e+00> : vector<16xf32>
    %165 = vector.multi_reduction <add>, %164, %cst_45 [1] : vector<16x16xf32> to vector<16xf32>
    %166 = vector.shape_cast %165 : vector<16xf32> to vector<16x1xf32>
    %167 = arith.mulf %164, %160 : vector<16x16xf32>
    %cst_46 = arith.constant dense<0.000000e+00> : vector<16xf32>
    %168 = vector.multi_reduction <add>, %167, %cst_46 [1] : vector<16x16xf32> to vector<16xf32>
    %169 = vector.shape_cast %168 : vector<16xf32> to vector<16x1xf32>
    %170 = arith.divf %169, %166 : vector<16x1xf32>
    %cst_47 = arith.constant -4.28571415 : f32
    %171 = vector.broadcast %cst_47 : f32 to vector<16x1xf32>
    %172 = arith.mulf %171, %170 : vector<16x1xf32>
    %cst_48 = arith.constant dense<0.000000e+00> : vector<1xf32>
    %173 = vector.multi_reduction <add>, %172, %cst_48 [0] : vector<16x1xf32> to vector<1xf32>
    %174 = vector.shape_cast %173 : vector<1xf32> to vector<1x1xf32>
    %cst_49 = arith.constant 6.250000e-02 : f32
    %175 = vector.broadcast %cst_49 : f32 to vector<1x1xf32>
    %176 = arith.mulf %174, %175 : vector<1x1xf32>
    %c0_50 = arith.constant 0 : index
    %c0_51 = arith.constant 0 : index
    %177 = vector.load %arg4[%c0_50, %c0_51] : memref<1x1xf32, #tpu.memory_space<vmem>>, vector<1x1xf32>
    tpu.vector_store %arg4[%c0_50, %c0_51], %176 {strides = array<i32>} : memref<1x1xf32, #tpu.memory_space<vmem>>, vector<1x1xf32>,
    %c0_52 = arith.constant 0 : index
    %c0_53 = arith.constant 0 : index
    %178 = vector.load %arg5[%c0_52, %c0_53] : memref<1x16xf32, #tpu.memory_space<vmem>>, vector<1x16xf32>
    tpu.vector_store %arg5[%c0_52, %c0_53], %134 {strides = array<i32>} : memref<1x16xf32, #tpu.memory_space<vmem>>, vector<1x16xf32>,
    return
  }
  func.func @transform_0(%arg0: i32) -> (i32, i32) {
    %c0_i32 = arith.constant 0 : i32
    %c0_i32_0 = arith.constant 0 : i32
    %c0_i32_1 = arith.constant 0 : i32
    return %c0_i32, %c0_i32_0 : i32, i32
  }
  func.func @transform_1(%arg0: i32) -> (i32, i32) {
    %c0_i32 = arith.constant 0 : i32
    %c0_i32_0 = arith.constant 0 : i32
    %c0_i32_1 = arith.constant 0 : i32
    return %c0_i32, %c0_i32_0 : i32, i32
  }
  func.func @transform_2(%arg0: i32) -> (i32, i32) {
    %c0_i32 = arith.constant 0 : i32
    %c0_i32_0 = arith.constant 0 : i32
    %c0_i32_1 = arith.constant 0 : i32
    return %c0_i32, %c0_i32_0 : i32, i32
  }
  func.func @transform_3(%arg0: i32) -> (i32, i32) {
    %c0_i32 = arith.constant 0 : i32
    %c0_i32_0 = arith.constant 0 : i32
    %c0_i32_1 = arith.constant 0 : i32
    return %c0_i32, %c0_i32_0 : i32, i32
  }
  func.func @transform_4(%arg0: i32) -> (i32, i32) {
    %c0_i32 = arith.constant 0 : i32
    %c0_i32_0 = arith.constant 0 : i32
    %c0_i32_1 = arith.constant 0 : i32
    return %c0_i32, %c0_i32_0 : i32, i32
  }
}

</mosaic_0001>

<bundles_post_ra>
// kernel: tpu_custom_call.1
= control target key start
LH: loop header
LB: loop body
LE: loop exit
PB: predicated region body
PF: predicated region fallthrough
CT: control target
= control target key end

     0   :  { %10 = vsyncpa [#allocation3], 0  ;;  %s878_s0 = inlined_call_operand.hbm [shape: f32[16,32], index: 0, kind: input, shape index: {}]   ;;  %s879_s1 = inlined_call_operand.hbm [shape: f32[16,32], index: 1, kind: input, shape index: {}]   ;;  %s880_s2 = inlined_call_operand.vmem [shape: s32[1,16], index: 2, kind: input, shape index: {}]   ;;  %s881_s3 = inlined_call_operand.hbm [shape: f32[1,1], index: 3, kind: output, shape index: {0}]   ;;  %s882_s4 = inlined_call_operand.hbm [shape: f32[1,16], index: 4, kind: output, shape index: {1}]  }
   0x1   :  { %11 = vsyncpa [#allocation6], 0 }
   0x2   :  { %12 = vsyncpa [#allocation4], 0 }
   0x3   :  { %13 = vsyncpa [#allocation9], 0  ;;  %s664_s15 = smov [#allocation2]   ;;  %s568_s19 = scalar_lea.hbm %s878_s0, 256 }
   0x4   :  { %s19_s16 = sshll.u32 %s664_s15, 4  ;;  %p569_p0 = scmp.ne.s32.totalorder %s878_s0, %s568_s19  ;;  %s20_s16 = int_to_ptr.vmem [resolvable:$true] %s19_s16 }
   0x5   :  { %p572_p1 = scmp.lt.u32.totalorder %s568_s19, %s878_s0 }
   0x7   :  { %p574_p2 = pnand %p572_p1, %p569_p0 }
   0x9   :  { %577 = shalt.err (!%p574_p2)
}
   0xa   :  { %s578_s24 = scalar_lea.vmem %s20_s16, 256  ;;  %p583_p4 = scmp.lt.s32.totalorder %s20_s16, %s20_s16 }
   0xb   :  { %p579_p3 = scmp.ne.s32.totalorder %s20_s16, %s578_s24  ;;  %p584_p5 = scmp.lt.s32.totalorder %s578_s24, %s578_s24 }
   0xd   :  { %p585_p6 = por %p584_p5, %p583_p4 }
   0xf   :  { %p586_p7 = pnand %p585_p6, %p579_p3 }
  0x11   :  { %589 = shalt.err (!%p586_p7)
}
  0x12   :  { %s665_s25 = smov 128   ;;  %s666_s26 = smov 8  }
  0x13   :  { %25 = dma.hbm_to_vmem [thread:$0]  %s878_s0, 256, %s20_s16, [#allocation3], %s665_s25, %s665_s25, %s666_s26  }
  0x14   :  { %s667_s29 = smov [#allocation5]   ;;  %s590_s7 = scalar_lea.hbm %s879_s1, 256 }
  0x15   :  { %s31_s30 = sshll.u32 %s667_s29, 4  ;;  %p591_p8 = scmp.ne.s32.totalorder %s879_s1, %s590_s7  ;;  %s32_s30 = int_to_ptr.vmem [resolvable:$true] %s31_s30 }
  0x16   :  { %p594_p9 = scmp.lt.u32.totalorder %s590_s7, %s879_s1 }
  0x18   :  { %p596_p10 = pnand %p594_p9, %p591_p8 }
  0x1a   :  { %599 = shalt.err (!%p596_p10)
}
  0x1b   :  { %s600_s12 = scalar_lea.vmem %s32_s30, 256  ;;  %p605_p12 = scmp.lt.s32.totalorder %s32_s30, %s32_s30 }
  0x1c   :  { %p601_p11 = scmp.ne.s32.totalorder %s32_s30, %s600_s12  ;;  %p606_p13 = scmp.lt.s32.totalorder %s600_s12, %s600_s12 }
  0x1e   :  { %p607_p0 = por %p606_p13, %p605_p12 }
  0x20   :  { %p608_p1 = pnand %p607_p0, %p601_p11 }
  0x22   :  { %611 = shalt.err (!%p608_p1)
}
  0x23   :  { %37 = dma.hbm_to_vmem [thread:$0]  %s879_s1, 256, %s32_s30, [#allocation6], %s665_s25, %s665_s25, %s666_s26  }
  0x24   :  { %656 = dma.done.wait [#allocation3], 256  }
  0x25   :  { %657 = vsyncadd [#allocation3], 4294967040 }
  0x26   :  { %658 = dma.done.wait [#allocation6], 256  }
  0x27   :  { %659 = vsyncadd [#allocation6], 4294967040  ;;  %v98_v0 = vld [vmem:[#allocation5] sm:$0xff]  ;;  %vm102_vm0 = vcmask 261120   ;;  %v99_v1 = vld [vmem:[#allocation5 + $0x8] sm:$0xff]  ;;  %v46_v6 = vlaneseq  ;;  %vm89_vm2 = vcmask 130048  }
  0x28   :  { %v100_v2 = vmul.f32 %v98_v0, %v98_v0  ;;  %v101_v3 = vmul.f32 %v99_v1, %v99_v1  ;;  %v79_v7 = vld [vmem:[%s880_s2] sm:$0x1]  ;;  %v668_v18 = vmov 0   ;;  %vm763_vm9 = vmpackc.low %vm102_vm0, %vm102_vm0  ;;  %vm669_vm11 = vmmov 1   ;;  %v303_v42 = vld [vmem:[#allocation2 + $0x8] sm:$0xff]  ;;  %s671_s1 = smov [#allocation8]  }
  0x29   :  { %v727_v8 = vshrl.u32 %v46_v6, 7  ;;  %v729_v9 = vand.u32 127, %v46_v6  ;;  %v80_v10 = vcvt.s32.f32 %v79_v7  ;;  %v670_v38 = vmov 0.0   ;;  %v302_v41 = vld [vmem:[#allocation2] sm:$0xff]  ;;  %s473_s2 = sshll.u32 %s671_s1, 4  ;;  %s474_s2 = int_to_ptr.vmem [resolvable:$true] %s473_s2 }
  0x2a   :  { %v103_v4 = vsel %vm102_vm0, %v100_v2, 0.0  ;;  %v106_v5 = vsel %vm102_vm0, %v101_v3, 0.0  ;;  %v527_v43 = vpack.c.bf16 %v303_v42, %v302_v41  ;;  %518 = vmatprep.mubr.msk.f32.mxu1 %vm102_vm0, %v302_v41  ;;  %s612_s16 = scalar_lea.vmem %s474_s2, 16  ;;  %s616_s17 = scalar_lea.vmem %s474_s2, 32 }
  0x2b   :  { %104 = vadd.xlane.f32.xlu0 %v103_v4  ;;  %v84_v11 = vsub.s32 0, %v727_v8  ;;  %v733_v12 = vadd.s32 8, %v727_v8  ;;  %vm51_vm1 = vcmp.eq.s32.totalorder %v727_v8, %v729_v9  ;;  %vm57_vm4 = vcmp.ge.s32.totalorder %v729_v9, 4  ;;  %p613_p2 = scmp.ne.s32.totalorder %s474_s2, %s612_s16  ;;  %p617_p3 = scmp.lt.s32.totalorder %s474_s2, %s474_s2 }
  0x2c   :  { %vm65_vm5 = vcmp.ge.s32.totalorder %v729_v9, 8  ;;  %v58_v19 = vsel %vm57_vm4, 1, %v668_v18  ;;  %vm74_vm7 = vcmp.ge.s32.totalorder %v729_v9, 12  ;;  %vm417_vm12 = vmxor %vm51_vm1, %vm669_vm11  ;;  %529 = vmatprep.subr.msk.bf16.mxu1 %vm763_vm9, %v527_v43  ;;  %p618_p4 = scmp.lt.s32.totalorder %s616_s17, %s612_s16 }
  0x2d   :  { %v737_v13 = vrot.slane %v80_v10, %v84_v11  ;;  %vm52_vm3 = vcmp.eq.s32.totalorder %v733_v12, %v729_v9  ;;  %vm69_vm6 = vcmp.ge.s32.totalorder %v733_v12, 12  ;;  %v756_v20 = vsel %vm65_vm5, 1, %v668_v18  ;;  %532 = vmatpush3.bf16.xpose.msk.msra.mxu1 %vm763_vm9, %v527_v43 }
  0x2e   :  { %v71_v21 = vsel %vm69_vm6, 1, %v668_v18  ;;  %v67_v22 = vadd.s32 %v756_v20, %v58_v19  ;;  %v75_v24 = vsel %vm74_vm7, 1, %v668_v18  ;;  %vm418_vm15 = vmxor %vm52_vm3, %vm669_vm11  ;;  %vm53_vm6 = vcmp.ge.s32.totalorder %v727_v8, 4  ;;  %p619_p5 = por %p618_p4, %p617_p3 }
  0x2f   :  { %107 = vadd.xlane.f32.xlu0 %v106_v5  ;;  %v87_v14 = vsel %vm51_vm1, %v737_v13, 0.0  ;;  %v88_v15 = vsel %vm52_vm3, %v737_v13, 0.0  ;;  %v73_v23 = vadd.s32 2, %v71_v21  ;;  %v55_v44 = vsel %vm53_vm6, 1, %v668_v18 }
  0x30   :  { %v90_v16 = vsel %vm89_vm2, %v87_v14, 0.0  ;;  %v93_v17 = vsel %vm89_vm2, %v88_v15, 0.0  ;;  %v76_v25 = vadd.s32 %v75_v24, %v67_v22  ;;  %p620_p6 = pnand %p619_p5, %p613_p2 }
  0x31   :  { %91 = vadd.xlane.f32.xlu1 %v90_v16 }
  0x32   :  { %vm78_vm8 = vcmp.eq.s32.totalorder %v73_v23, %v76_v25  ;;  %vm77_vm7 = vcmp.eq.s32.totalorder %v55_v44, %v76_v25 }
  0x34   :  { %519 = vmatmul.mubr.msk.f32.vlgmr.msra.gmra.mrb[0].mxu1 %vm102_vm0, %v303_v42 }
  0x35   :  { %94 = vadd.xlane.f32.xlu1 %v93_v17 }
  0xb8   :  { %v105_v26 = vpop.xlane.xlu0 %104 }
  0xb9   :  { %v109_v27 = vmax.f32 %v105_v26, 1e-24 }
  0xbb   :  { %542 = vrsqrt.f32 %v109_v27 }
  0xbc   :  { %v108_v28 = vpop.xlane.xlu0 %107 }
  0xbd   :  { %v110_v29 = vmax.f32 %v108_v28, 1e-24 }
  0xbe   :  { %v92_v36 = vpop.xlane.xlu1 %91 }
  0xbf   :  { %544 = vrsqrt.f32 %v110_v29  ;;  %vm96_vm10 = vcmp.eq.f32.partialorder %v92_v36, %v737_v13 }
  0xc0   :  { %vm419_vm13 = vmand %vm96_vm10, %vm417_vm12 }
  0xc1   :  { %v780_v39 = vsel %vm419_vm13, 1.0, %v670_v38  ;;  %vm197_vm12 = vmxor %vm78_vm8, %vm669_vm11 }
  0xc2   :  { %v95_v37 = vpop.xlane.xlu1 %94  ;;  %vm196_vm13 = vmxor %vm77_vm7, %vm669_vm11 }
  0xc3   :  { %vm97_vm14 = vcmp.eq.f32.partialorder %v95_v37, %v737_v13  ;;  %vm491_vm8 = vmneg %vm65_vm5 }
  0xc4   :  { %vm420_vm4 = vmand %vm97_vm14, %vm418_vm15  ;;  %v223_v2 = vsel %vm491_vm8, 0.49999875, %v670_v38 }
  0xc5   :  { %v543_v30 = vpop.eup %542  ;;  %v788_v40 = vsel %vm420_vm4, 1.0, %v670_v38  ;;  %vm199_vm15 = vmand %vm97_vm14, %vm197_vm12  ;;  %v226_v6 = vsel %vm65_vm5, 0.49999875, %v223_v2 }
  0xc6   :  { %v113_v31 = vmul.f32 %v543_v30, %v98_v0 }
  0xc8   :  { %511 = vmatprep.mubr.msk.f32.mxu0 %vm102_vm0, %v113_v31 }
  0xc9   :  { %v545_v32 = vpop.eup %544 }
  0xca   :  { %v114_v33 = vmul.f32 %v545_v32, %v99_v1  ;;  %v224_v1 = vsel %vm491_vm8, 0.24999969, %v670_v38 }
  0xcb   :  { %v227_v5 = vsel %vm65_vm5, 0.24999969, %v224_v1  ;;  %vm455_vm5 = vcmask 122880  }
  0xcc   :  { %v521_v35 = vpack.c.bf16 %v114_v33, %v113_v31 }
  0xce   :  { %523 = vmatprep.subr.msk.bf16.mxu0 %vm763_vm9, %v521_v35 }
  0xcf   :  { %526 = vmatpush3.bf16.xpose.msk.msra.mxu0 %vm763_vm9, %v521_v35  ;;  %vm228_vm9 = vcmp.eq.s32.totalorder %v727_v8, %v756_v20 }
  0xd0   :  { %v492_v21 = vsel %vm228_vm9, 1.0, %v670_v38 }
  0xd6   :  { %512 = vmatmul.mubr.msk.f32.vlgmr.msra.gmra.mrb[0].mxu0 %vm102_vm0, %v114_v33  ;;  %vm198_vm0 = vmand %vm96_vm10, %vm196_vm13 }
 0x107   :  { %v520_v18 = vpop.f32.mrb[0].mxu1 }
 0x108   :  { %v376_v19 = vpop.f32.mrb[1].mxu1 }
 0x1a9   :  { %v513_v45 = vpop.f32.mrb[0].mxu0 }
 0x1aa   :  { %v201_v46 = vsel %vm199_vm15, %v513_v45, 0.0  ;;  %v212_v47 = vsel %vm97_vm14, 0.0, %v513_v45  ;;  %v187_v48 = vpop.f32.mrb[1].mxu0 }
 0x1ab   :  { %v203_v49 = vsel %vm89_vm2, %v201_v46, 0.0  ;;  %v214_v50 = vsel %vm89_vm2, %v212_v47, 0.0  ;;  %v200_v51 = vsel %vm198_vm0, %v187_v48, 0.0  ;;  %v211_v52 = vsel %vm96_vm10, 0.0, %v187_v48 }
 0x1ac   :  { %v202_v53 = vsel %vm89_vm2, %v200_v51, 0.0  ;;  %v213_v54 = vsel %vm89_vm2, %v211_v52, 0.0  ;;  %vm233_vm10 = vcmask 123904   ;;  %v385_v48 = vmul.f32 3.3333333, %v376_v19 }
 0x1ad   :  { %v204_v55 = vadd.f32 %v203_v49, %v202_v53  ;;  %v215_v56 = vadd.f32 %v214_v50, %v213_v54  ;;  %v386_v50 = vmul.f32 3.3333333, %v520_v18 }
 0x1ae   :  { %v387_v53 = vsel %vm89_vm2, %v385_v48, -inf }
 0x1af   :  { %v205_v57 = vrot.slane %v204_v55, 4  ;;  %v216_v58 = vrot.slane %v215_v56, 4  ;;  %v390_v54 = vsel %vm89_vm2, %v386_v50, -inf }
 0x1b1   :  { %v206_v59 = vadd.f32 %v205_v57, %v204_v55  ;;  %v217_v60 = vadd.f32 %v216_v58, %v215_v56 }
 0x1b3   :  { %v207_v61 = vrot.slane %v206_v59, 2  ;;  %v218_v62 = vrot.slane %v217_v60, 2 }
 0x1b5   :  { %v208_v63 = vadd.f32 %v207_v61, %v206_v59  ;;  %v219_v0 = vadd.f32 %v218_v62, %v217_v60 }
 0x1b7   :  { %v220_v3 = vrot.slane %v219_v0, 1  ;;  %v209_v4 = vrot.slane %v208_v63, 1 }
 0x1b9   :  { %v221_v7 = vadd.f32 %v220_v3, %v219_v0  ;;  %v210_v10 = vadd.f32 %v209_v4, %v208_v63 }
 0x1bb   :  { %v262_v11 = vmul.f32 %v227_v5, %v221_v7  ;;  %v231_v13 = vmul.f32 %v226_v6, %v210_v10 }
 0x1bd   :  { %v263_v14 = vsel %vm228_vm9, %v262_v11, -1e+30  ;;  %v232_v15 = vsel %vm228_vm9, %v231_v13, -1e+30 }
 0x1be   :  { %v264_v16 = vsel %vm233_vm10, %v263_v14, -inf  ;;  %v234_v17 = vsel %vm233_vm10, %v232_v15, -inf }
 0x1bf   :  { %265 = vmax.xlane.f32.xlu0 %v264_v16  ;;  %235 = vmax.xlane.f32.xlu1 %v234_v17 }
 0x24c   :  { %v266_v22 = vpop.xlane.xlu0 %265  ;;  %v236_v23 = vpop.xlane.xlu1 %235 }
 0x24d   :  { %v267_v24 = vmul.f32 %v492_v21, %v266_v22  ;;  %v237_v25 = vmul.f32 %v492_v21, %v236_v23 }
 0x24f   :  { %v268_v20 = vsel %vm233_vm10, %v267_v24, 0.0  ;;  %v238_v26 = vsel %vm233_vm10, %v237_v25, 0.0 }
 0x250   :  { %v269_v27 = vrot.slane %v268_v20, 4  ;;  %v239_v28 = vrot.slane %v238_v26, 4 }
 0x252   :  { %v270_v29 = vadd.f32 %v269_v27, %v268_v20  ;;  %v240_v30 = vadd.f32 %v239_v28, %v238_v26 }
 0x254   :  { %v271_v31 = vrot.slane %v270_v29, 2  ;;  %v241_v32 = vrot.slane %v240_v30, 2 }
 0x256   :  { %v272_v33 = vadd.f32 %v271_v31, %v270_v29  ;;  %v242_v34 = vadd.f32 %v241_v32, %v240_v30 }
 0x258   :  { %v273_v35 = vrot.slane %v272_v33, 1  ;;  %v243_v36 = vrot.slane %v242_v34, 1 }
 0x25a   :  { %v274_v37 = vadd.f32 %v273_v35, %v272_v33  ;;  %v244_v38 = vadd.f32 %v243_v36, %v242_v34 }
 0x25c   :  { %v275_v41 = vsub.f32 %v262_v11, %v274_v37  ;;  %v245_v42 = vsub.f32 %v231_v13, %v244_v38 }
 0x25e   :  { %v276_v43 = vmul.f32 1.442695, %v275_v41  ;;  %v246_v44 = vmul.f32 1.442695, %v245_v42  ;;  %v425_v42 = vsel %vm89_vm2, %v780_v39, 0.0 }
 0x260   :  { %546 = vpow2.f32 %v276_v43  ;;  %v428_v43 = vsel %vm89_vm2, %v788_v40, 0.0 }
 0x261   :  { %548 = vpow2.f32 %v246_v44 }
 0x26a   :  { %v547_v45 = vpop.eup %546 }
 0x26b   :  { %v549_v46 = vpop.eup %548  ;;  %v278_v47 = vmul.f32 %v547_v45, %v492_v21 }
 0x26c   :  { %v248_v49 = vmul.f32 %v549_v46, %v492_v21 }
 0x26d   :  { %v279_v51 = vsel %vm233_vm10, %v278_v47, 0.0 }
 0x26e   :  { %280 = vadd.xlane.f32.xlu0 %v279_v51  ;;  %v249_v52 = vsel %vm233_vm10, %v248_v49, 0.0 }
 0x26f   :  { %250 = vadd.xlane.f32.xlu1 %v249_v52 }
 0x272   :  { %388 = vmax.xlane.f32.xlu0 %v387_v53 }
 0x273   :  { %391 = vmax.xlane.f32.xlu1 %v390_v54 }
 0x2fb   :  { %v281_v55 = vpop.xlane.xlu0 %280 }
 0x2fc   :  { %v282_v56 = vmul.f32 %v492_v21, %v281_v55  ;;  %v251_v57 = vpop.xlane.xlu1 %250 }
 0x2fd   :  { %v252_v58 = vmul.f32 %v492_v21, %v251_v57 }
 0x2fe   :  { %v283_v59 = vsel %vm233_vm10, %v282_v56, 0.0 }
 0x2ff   :  { %v284_v60 = vrot.slane %v283_v59, 4  ;;  %v253_v61 = vsel %vm233_vm10, %v252_v58, 0.0  ;;  %v389_v23 = vpop.xlane.xlu0 %388 }
 0x300   :  { %v254_v62 = vrot.slane %v253_v61, 4  ;;  %v392_v24 = vpop.xlane.xlu1 %391  ;;  %v393_v25 = vsub.f32 %v385_v48, %v389_v23 }
 0x301   :  { %v285_v63 = vadd.f32 %v284_v60, %v283_v59  ;;  %v394_v20 = vsub.f32 %v386_v50, %v392_v24 }
 0x302   :  { %v255_v0 = vadd.f32 %v254_v62, %v253_v61 }
 0x303   :  { %v286_v1 = vrot.slane %v285_v63, 2 }
 0x304   :  { %v256_v2 = vrot.slane %v255_v0, 2 }
 0x305   :  { %v287_v3 = vadd.f32 %v286_v1, %v285_v63 }
 0x306   :  { %v257_v5 = vadd.f32 %v256_v2, %v255_v0 }
 0x307   :  { %v288_v4 = vrot.slane %v287_v3, 1 }
 0x308   :  { %v258_v7 = vrot.slane %v257_v5, 1 }
 0x309   :  { %v289_v6 = vadd.f32 %v288_v4, %v287_v3 }
 0x30a   :  { %v259_v10 = vadd.f32 %v258_v7, %v257_v5 }
 0x30b   :  { %550 = vrcp.f32 %v289_v6 }
 0x30c   :  { %552 = vrcp.f32 %v259_v10 }
 0x315   :  { %v551_v11 = vpop.eup %550 }
 0x316   :  { %v291_v13 = vmul.f32 %v551_v11, %v547_v45  ;;  %v553_v14 = vpop.eup %552 }
 0x317   :  { %v261_v15 = vmul.f32 %v553_v14, %v549_v46 }
 0x318   :  { %554 = vrcp.f32 %v291_v13 }
 0x322   :  { %v555_v16 = vpop.eup %554 }
 0x323   :  { %v293_v17 = vmul.f32 %v555_v16, %v261_v15 }
 0x325   :  { %v295_v18 = vsel %vm52_vm3, %v293_v17, 0.0  ;;  %v294_v19 = vsel %vm51_vm1, %v293_v17, 0.0  ;;  %456 = vst.msk [vmem:[#allocation8] sm:$0x1] %vm455_vm5, %v293_v17 }
 0x326   :  { %v299_v21 = vsel %vm89_vm2, %v295_v18, 0.0  ;;  %v296_v22 = vsel %vm89_vm2, %v294_v19, 0.0 }
 0x327   :  { %300 = vadd.xlane.f32.xlu1 %v299_v21  ;;  %297 = vadd.xlane.f32.xlu0 %v296_v22 }
 0x3b4   :  { %v298_v26 = vpop.xlane.xlu0 %297  ;;  %v301_v27 = vpop.xlane.xlu1 %300 }
 0x3b5   :  { %v395_v28 = vmul.f32 %v393_v25, %v298_v26  ;;  %v396_v29 = vmul.f32 %v394_v20, %v301_v27 }
 0x3b7   :  { %v397_v30 = vmul.f32 %v395_v28, %v293_v17  ;;  %v398_v31 = vmul.f32 %v396_v29, %v293_v17 }
 0x3b9   :  { %v399_v32 = vmul.f32 1.442695, %v397_v30  ;;  %v401_v33 = vmul.f32 1.442695, %v398_v31 }
 0x3bb   :  { %556 = vpow2.f32 %v399_v32 }
 0x3bc   :  { %558 = vpow2.f32 %v401_v33 }
 0x3c5   :  { %v557_v34 = vpop.eup %556 }
 0x3c6   :  { %v559_v35 = vpop.eup %558  ;;  %v403_v36 = vsel %vm51_vm1, 0.0, %v557_v34 }
 0x3c7   :  { %v405_v37 = vsel %vm89_vm2, %v403_v36, 0.0  ;;  %v404_v38 = vsel %vm52_vm3, 0.0, %v559_v35 }
 0x3c8   :  { %406 = vadd.xlane.f32.xlu0 %v405_v37  ;;  %v408_v41 = vsel %vm89_vm2, %v404_v38, 0.0 }
 0x3c9   :  { %409 = vadd.xlane.f32.xlu1 %v408_v41 }
 0x3cc   :  { %426 = vadd.xlane.f32.xlu0 %v425_v42 }
 0x3cd   :  { %429 = vadd.xlane.f32.xlu1 %v428_v43 }
 0x455   :  { %v407_v8 = vpop.xlane.xlu0 %406 }
 0x456   :  { %560 = vlog2.f32 %v407_v8  ;;  %v410_v44 = vpop.xlane.xlu1 %409 }
 0x457   :  { %562 = vlog2.f32 %v410_v44 }
 0x460   :  { %v561_v45 = vpop.eup %560 }
 0x461   :  { %v563_v46 = vpop.eup %562  ;;  %v412_v9 = vmul.f32 0.6931472, %v561_v45 }
 0x462   :  { %v414_v12 = vmul.f32 0.6931472, %v563_v46 }
 0x463   :  { %v415_v47 = vsub.f32 %v397_v30, %v412_v9 }
 0x464   :  { %v416_v48 = vsub.f32 %v398_v31, %v414_v12 }
 0x465   :  { %v431_v49 = vmul.f32 %v780_v39, %v415_v47 }
 0x466   :  { %v432_v50 = vmul.f32 %v788_v40, %v416_v48 }
 0x467   :  { %v433_v51 = vsel %vm89_vm2, %v431_v49, 0.0 }
 0x468   :  { %434 = vadd.xlane.f32.xlu0 %v433_v51  ;;  %v436_v52 = vsel %vm89_vm2, %v432_v50, 0.0 }
 0x469   :  { %437 = vadd.xlane.f32.xlu1 %v436_v52 }
 0x46a   :  { %623 = shalt.err (!%p620_p6)
}
 0x46b   :  { %s624_s20 = scalar_lea.hbm %s882_s4, 16 }
 0x46c   :  { %p625_p7 = scmp.ne.s32.totalorder %s882_s4, %s624_s20  ;;  %p628_p8 = scmp.lt.u32.totalorder %s624_s20, %s882_s4 }
 0x46e   :  { %p630_p9 = pnand %p628_p8, %p625_p7 }
 0x470   :  { %633 = shalt.err (!%p630_p9)
}
 0x471   :  { %476 = dma.vmem_to_hbm [thread:$0]  %s474_s2, 16, %s882_s4, [#allocation9]   ;;  %v427_v39 = vpop.xlane.xlu0 %426  ;;  %v430_v40 = vpop.xlane.xlu1 %429  ;;  %vm453_vm1 = vcmask 0  }
 0x472   :  { %564 = vrcp.f32 %v427_v39  ;;  %s672_s27 = smov [#allocation7]  }
 0x473   :  { %566 = vrcp.f32 %v430_v40  ;;  %s463_s4 = sshll.u32 %s672_s27, 4  ;;  %s464_s4 = int_to_ptr.vmem [resolvable:$true] %s463_s4 }
 0x474   :  { %s634_s28 = scalar_lea.vmem %s464_s4, 16  ;;  %s638_s29 = scalar_lea.vmem %s464_s4, 32 }
 0x475   :  { %p635_p10 = scmp.ne.s32.totalorder %s464_s4, %s634_s28  ;;  %p639_p11 = scmp.lt.s32.totalorder %s464_s4, %s464_s4 }
 0x476   :  { %p640_p12 = scmp.lt.s32.totalorder %s638_s29, %s634_s28 }
 0x478   :  { %p641_p13 = por %p640_p12, %p639_p11 }
 0x47a   :  { %p642_p0 = pnand %p641_p13, %p635_p10 }
 0x47c   :  { %v565_v53 = vpop.eup %564 }
 0x47d   :  { %v567_v55 = vpop.eup %566 }
 0x4f5   :  { %v435_v54 = vpop.xlane.xlu0 %434 }
 0x4f6   :  { %v440_v56 = vmul.f32 %v565_v53, %v435_v54  ;;  %v438_v57 = vpop.xlane.xlu1 %437 }
 0x4f7   :  { %v442_v58 = vmul.f32 %v567_v55, %v438_v57 }
 0x4f8   :  { %v443_v59 = vmul.f32 -4.285714, %v440_v56 }
 0x4f9   :  { %v444_v60 = vmul.f32 -4.285714, %v442_v58 }
 0x4fb   :  { %v445_v61 = vadd.f32 %v444_v60, %v443_v59 }
 0x4fd   :  { %v446_v62 = vrot.slane %v445_v61, 4 }
 0x4ff   :  { %v447_v63 = vadd.f32 %v446_v62, %v445_v61 }
 0x501   :  { %v448_v0 = vrot.slane %v447_v63, 2 }
 0x503   :  { %v449_v1 = vadd.f32 %v448_v0, %v447_v63 }
 0x505   :  { %v450_v2 = vrot.slane %v449_v1, 1 }
 0x507   :  { %v451_v3 = vadd.f32 %v450_v2, %v449_v1 }
 0x509   :  { %v452_v4 = vmul.f32 0.0625, %v451_v3 }
 0x50b   :  { %454 = vst.msk [vmem:[#allocation7] sm:$0x1] %vm453_vm1, %v452_v4 }
 0x50c   :  { %645 = shalt.err (!%p642_p0)
}
 0x50d   :  { %s646_s6 = scalar_lea.hbm %s881_s3, 16 }
 0x50e   :  { %p647_p1 = scmp.ne.s32.totalorder %s881_s3, %s646_s6  ;;  %p650_p2 = scmp.lt.u32.totalorder %s646_s6, %s881_s3 }
 0x510   :  { %p652_p3 = pnand %p650_p2, %p647_p1 }
 0x512   :  { %655 = shalt.err (!%p652_p3)
}
 0x513   :  { %466 = dma.vmem_to_hbm [thread:$0]  %s464_s4, 16, %s881_s3, [#allocation4]  }
 0x514   :  { %660 = dma.done.wait [#allocation4], 16  }
 0x515   :  { %661 = vsyncadd [#allocation4], 4294967280 }
 0x516   :  { %662 = dma.done.wait [#allocation9], 16  }
 0x517   :  { %663 = vsyncadd [#allocation9], 4294967280 }
 0x518   :  { %483 = vsyncpa [#allocation3], 1 }
 0x519   :  { %484 = vsyncpa [#allocation6], 1 }
 0x51a   :  { %485 = vsyncpa [#allocation4], 1 }
 0x51b   :  { %486 = vsyncpa [#allocation9], 1 }

</bundles_post_ra>
